<compile_context>
chip_gen: v7x
topology: tpu7x:2x2x1
jax: 0.10.0
libtpu: 0.0.40
codegen_flags: <defaults>
</compile_context>

<pallas_src>
import jax
import jax.numpy as jnp
from jax.experimental import pallas as pl
from jax.experimental.pallas import tpu as pltpu


def _kv_scatter_kernel(pos_ref,                     # scalar-prefetch: (L,) int32 in SMEM
                       k_cache_ref, v_cache_ref,    # HBM refs, aliased to outputs (not read)
                       k_val_ref, v_val_ref,        # (B, L, HD) HBM refs
                       k_out_ref, v_out_ref,        # (B, S, HD) HBM refs (aliased caches)
                       sem):                        # DMA semaphores (2, L)
    del k_cache_ref, v_cache_ref
    L = pos_ref.shape[0]
    copies = []
    # Issue all 2L HBM->HBM row copies first so every transfer overlaps.
    for i in range(L):
        p = pos_ref[i]
        ck = pltpu.make_async_copy(k_val_ref.at[:, pl.ds(i, 1), :],
                                   k_out_ref.at[:, pl.ds(p, 1), :],
                                   sem.at[0, i])
        cv = pltpu.make_async_copy(v_val_ref.at[:, pl.ds(i, 1), :],
                                   v_out_ref.at[:, pl.ds(p, 1), :],
                                   sem.at[1, i])
        ck.start()
        cv.start()
        copies.append(ck)
        copies.append(cv)
    for c in copies:
        c.wait()


def _kv_contiguous_kernel(pos_ref,                  # scalar-prefetch: (L,) int32, pos = [p0, p0+L)
                          k_cache_ref, v_cache_ref,
                          k_val_ref, v_val_ref,     # (B, L, HD) HBM refs
                          k_out_ref, v_out_ref,     # (B, S, HD) HBM refs (aliased caches)
                          sem):                     # DMA semaphores (2,)
    del k_cache_ref, v_cache_ref
    L = k_val_ref.shape[1]
    p0 = pos_ref[0]
    ck = pltpu.make_async_copy(k_val_ref, k_out_ref.at[:, pl.ds(p0, L), :], sem.at[0])
    cv = pltpu.make_async_copy(v_val_ref, v_out_ref.at[:, pl.ds(p0, L), :], sem.at[1])
    ck.start()
    cv.start()
    ck.wait()
    cv.wait()


def kv_cache_update(k_cache, v_cache, input_pos, k_val, v_val, *, contiguous=False):
    """Functional equivalent of KVCache.forward: returns (updated_k, updated_v).

    Set contiguous=True (static) when input_pos is a run [p0, p0+L) to use the
    single-DMA fast path.  Caller should donate k_cache / v_cache for an
    in-place update (jax.jit(..., donate_argnums=(0, 1))).
    """
    B, S, H, D = k_cache.shape
    L = input_pos.shape[0]
    assert k_val.shape == (B, L, H, D) and v_val.shape == (B, L, H, D)
    HD = H * D

    # Lane-dense layout: collapse heads into the last dim (free reshape).
    kc = k_cache.reshape(B, S, HD)
    vc = v_cache.reshape(B, S, HD)
    kv = k_val.reshape(B, L, HD)
    vv = v_val.reshape(B, L, HD)

    kernel = _kv_contiguous_kernel if contiguous else _kv_scatter_kernel
    sem_shape = (2,) if contiguous else (2, L)

    # Only the new rows move (read once, written once into the cache).
    val_bytes = kv.size * kv.dtype.itemsize + vv.size * vv.dtype.itemsize
    cost = pl.CostEstimate(flops=0, transcendentals=0, bytes_accessed=2 * val_bytes)

    grid_spec = pltpu.PrefetchScalarGridSpec(
        num_scalar_prefetch=1,                       # input_pos -> SMEM
        grid=(1,),
        in_specs=[
            pl.BlockSpec(memory_space=pl.ANY),       # k_cache (aliased to output 0)
            pl.BlockSpec(memory_space=pl.ANY),       # v_cache (aliased to output 1)
            pl.BlockSpec(memory_space=pl.ANY),       # k_val
            pl.BlockSpec(memory_space=pl.ANY),       # v_val
        ],
        out_specs=[
            pl.BlockSpec(memory_space=pl.ANY),       # updated k_cache
            pl.BlockSpec(memory_space=pl.ANY),       # updated v_cache
        ],
        scratch_shapes=[pltpu.SemaphoreType.DMA(sem_shape)],
    )

    fn = pl.pallas_call(
        kernel,
        grid_spec=grid_spec,
        out_shape=(
            jax.ShapeDtypeStruct((B, S, HD), k_cache.dtype),
            jax.ShapeDtypeStruct((B, S, HD), v_cache.dtype),
        ),
        # call args are (input_pos, k_cache, v_cache, k_val, v_val); scalar
        # prefetch counts, so k_cache is input 1 and v_cache is input 2.
        input_output_aliases={1: 0, 2: 1},
        compiler_params=pltpu.CompilerParams(
            dimension_semantics=("arbitrary",)),
        cost_estimate=cost,
    )
    k_out, v_out = fn(input_pos.astype(jnp.int32), kc, vc, kv, vv)
    return k_out.reshape(B, S, H, D), v_out.reshape(B, S, H, D)


if __name__ == "__main__":
    # Module config: KVCache(batch_size=2, max_seq_length=16, n_heads=4, head_dim=32)
    B, S, H, D = 2, 16, 4, 32
    L = 8  # number of positions being updated this step

    key = jax.random.PRNGKey(0)
    kk, kvv, kp, kck, vck = jax.random.split(key, 5)

    # Non-zero initial caches: verifies aliasing really preserves untouched rows.
    k_cache0 = jax.random.normal(kck, (B, S, H, D), jnp.float32)
    v_cache0 = jax.random.normal(vck, (B, S, H, D), jnp.float32)

    k_val = jax.random.normal(kk, (B, L, H, D), jnp.float32)
    v_val = jax.random.normal(kvv, (B, L, H, D), jnp.float32)

    update = jax.jit(kv_cache_update,
                     static_argnames=("contiguous",),
                     donate_argnums=(0, 1))       # in-place cache update

    # --- general (arbitrary positions) scatter path -------------------------
    input_pos = jax.random.permutation(kp, S)[:L].astype(jnp.int32)
    k_ref = k_cache0.at[:, input_pos].set(k_val)   # pure-JAX index_copy_ reference
    v_ref = v_cache0.at[:, input_pos].set(v_val)

    k_out, v_out = update(k_cache0, v_cache0, input_pos, k_val, v_val)
    jax.block_until_ready((k_out, v_out))
    assert k_out.shape == (B, S, H, D) and v_out.shape == (B, S, H, D)
    assert jnp.allclose(k_out, k_ref), "k_cache scatter mismatch"
    assert jnp.allclose(v_out, v_ref), "v_cache scatter mismatch"

    # --- contiguous-positions fast path (prefill) ---------------------------
    k_cache1 = jax.random.normal(kck, (B, S, H, D), jnp.float32)
    v_cache1 = jax.random.normal(vck, (B, S, H, D), jnp.float32)
    pos_c = (5 + jnp.arange(L)).astype(jnp.int32)
    k_ref1 = k_cache1.at[:, pos_c].set(k_val)
    v_ref1 = v_cache1.at[:, pos_c].set(v_val)

    k_out1, v_out1 = update(k_cache1, v_cache1, pos_c, k_val, v_val, contiguous=True)
    jax.block_until_ready((k_out1, v_out1))
    assert jnp.allclose(k_out1, k_ref1), "k_cache contiguous update mismatch"
    assert jnp.allclose(v_out1, v_ref1), "v_cache contiguous update mismatch"

    print("KERNEL_OK")
</pallas_src>

<mosaic_0001>
module attributes {stable_mosaic.version = 11 : i64} {
  func.func @_kv_scatter_kernel(%arg0: i32, %arg1: memref<8xi32, #tpu.memory_space<smem>>, %arg2: memref<2x16x128xf32, #tpu.memory_space<any>>, %arg3: memref<2x16x128xf32, #tpu.memory_space<any>>, %arg4: memref<2x8x128xf32, #tpu.memory_space<any>>, %arg5: memref<2x8x128xf32, #tpu.memory_space<any>>, %arg6: memref<2x16x128xf32, #tpu.memory_space<any>>, %arg7: memref<2x16x128xf32, #tpu.memory_space<any>>, %arg8: memref<2x8x!tpu.dma_semaphore, #tpu.memory_space<semaphore_mem>>) attributes {dimension_semantics = [#tpu.dimension_semantics<arbitrary>], iteration_bounds = array<i64: 1>, scalar_prefetch = 1 : i64, scratch_operands = 1 : i64, tpu.core_type = #tpu.core_type<tc>, window_params = [{}, {}, {}, {}, {}, {}]} {
    %c0 = arith.constant 0 : index
    %0 = memref.load %arg1[%c0] : memref<8xi32, #tpu.memory_space<smem>>
    %c0_i32 = arith.constant 0 : i32
    %c0_i32_0 = arith.constant 0 : i32
    %c0_i32_1 = arith.constant 0 : i32
    %c0_i32_2 = arith.constant 0 : i32
    %c0_i32_3 = arith.constant 0 : i32
    %1 = tpu.memref_slice %arg4[%c0_i32_1, %c0_i32_2, %c0_i32_3] : memref<2x8x128xf32, #tpu.memory_space<any>> -> memref<2x1x128xf32, #tpu.memory_space<any>>
    %c0_i32_4 = arith.constant 0 : i32
    %c0_i32_5 = arith.constant 0 : i32
    %2 = tpu.memref_slice %arg6[%c0_i32_4, %0, %c0_i32_5] : memref<2x16x128xf32, #tpu.memory_space<any>> -> memref<2x1x128xf32, #tpu.memory_space<any>>
    %3 = tpu.memref_slice %arg8[%c0_i32, %c0_i32_0] : memref<2x8x!tpu.dma_semaphore, #tpu.memory_space<semaphore_mem>> -> memref<1x1x!tpu.dma_semaphore, #tpu.memory_space<semaphore_mem>>
    %4 = tpu.memref_squeeze %3 : memref<1x1x!tpu.dma_semaphore, #tpu.memory_space<semaphore_mem>> -> memref<!tpu.dma_semaphore, #tpu.memory_space<semaphore_mem>>
    tpu.enqueue_dma source(%1 : memref<2x1x128xf32, #tpu.memory_space<any>>) target(%2 : memref<2x1x128xf32, #tpu.memory_space<any>>) target_semaphore(%4 : memref<!tpu.dma_semaphore, #tpu.memory_space<semaphore_mem>>)
    %c1_i32 = arith.constant 1 : i32
    %c0_i32_6 = arith.constant 0 : i32
    %c0_i32_7 = arith.constant 0 : i32
    %c0_i32_8 = arith.constant 0 : i32
    %c0_i32_9 = arith.constant 0 : i32
    %5 = tpu.memref_slice %arg5[%c0_i32_7, %c0_i32_8, %c0_i32_9] : memref<2x8x128xf32, #tpu.memory_space<any>> -> memref<2x1x128xf32, #tpu.memory_space<any>>
    %c0_i32_10 = arith.constant 0 : i32
    %c0_i32_11 = arith.constant 0 : i32
    %6 = tpu.memref_slice %arg7[%c0_i32_10, %0, %c0_i32_11] : memref<2x16x128xf32, #tpu.memory_space<any>> -> memref<2x1x128xf32, #tpu.memory_space<any>>
    %7 = tpu.memref_slice %arg8[%c1_i32, %c0_i32_6] : memref<2x8x!tpu.dma_semaphore, #tpu.memory_space<semaphore_mem>> -> memref<1x1x!tpu.dma_semaphore, #tpu.memory_space<semaphore_mem>>
    %8 = tpu.memref_squeeze %7 : memref<1x1x!tpu.dma_semaphore, #tpu.memory_space<semaphore_mem>> -> memref<!tpu.dma_semaphore, #tpu.memory_space<semaphore_mem>>
    tpu.enqueue_dma source(%5 : memref<2x1x128xf32, #tpu.memory_space<any>>) target(%6 : memref<2x1x128xf32, #tpu.memory_space<any>>) target_semaphore(%8 : memref<!tpu.dma_semaphore, #tpu.memory_space<semaphore_mem>>)
    %c1 = arith.constant 1 : index
    %9 = memref.load %arg1[%c1] : memref<8xi32, #tpu.memory_space<smem>>
    %c0_i32_12 = arith.constant 0 : i32
    %c1_i32_13 = arith.constant 1 : i32
    %c0_i32_14 = arith.constant 0 : i32
    %c1_i32_15 = arith.constant 1 : i32
    %c0_i32_16 = arith.constant 0 : i32
    %10 = tpu.memref_slice %arg4[%c0_i32_14, %c1_i32_15, %c0_i32_16] : memref<2x8x128xf32, #tpu.memory_space<any>> -> memref<2x1x128xf32, #tpu.memory_space<any>>
    %c0_i32_17 = arith.constant 0 : i32
    %c0_i32_18 = arith.constant 0 : i32
    %11 = tpu.memref_slice %arg6[%c0_i32_17, %9, %c0_i32_18] : memref<2x16x128xf32, #tpu.memory_space<any>> -> memref<2x1x128xf32, #tpu.memory_space<any>>
    %12 = tpu.memref_slice %arg8[%c0_i32_12, %c1_i32_13] : memref<2x8x!tpu.dma_semaphore, #tpu.memory_space<semaphore_mem>> -> memref<1x1x!tpu.dma_semaphore, #tpu.memory_space<semaphore_mem>>
    %13 = tpu.memref_squeeze %12 : memref<1x1x!tpu.dma_semaphore, #tpu.memory_space<semaphore_mem>> -> memref<!tpu.dma_semaphore, #tpu.memory_space<semaphore_mem>>
    tpu.enqueue_dma source(%10 : memref<2x1x128xf32, #tpu.memory_space<any>>) target(%11 : memref<2x1x128xf32, #tpu.memory_space<any>>) target_semaphore(%13 : memref<!tpu.dma_semaphore, #tpu.memory_space<semaphore_mem>>)
    %c1_i32_19 = arith.constant 1 : i32
    %c1_i32_20 = arith.constant 1 : i32
    %c0_i32_21 = arith.constant 0 : i32
    %c1_i32_22 = arith.constant 1 : i32
    %c0_i32_23 = arith.constant 0 : i32
    %14 = tpu.memref_slice %arg5[%c0_i32_21, %c1_i32_22, %c0_i32_23] : memref<2x8x128xf32, #tpu.memory_space<any>> -> memref<2x1x128xf32, #tpu.memory_space<any>>
    %c0_i32_24 = arith.constant 0 : i32
    %c0_i32_25 = arith.constant 0 : i32
    %15 = tpu.memref_slice %arg7[%c0_i32_24, %9, %c0_i32_25] : memref<2x16x128xf32, #tpu.memory_space<any>> -> memref<2x1x128xf32, #tpu.memory_space<any>>
    %16 = tpu.memref_slice %arg8[%c1_i32_19, %c1_i32_20] : memref<2x8x!tpu.dma_semaphore, #tpu.memory_space<semaphore_mem>> -> memref<1x1x!tpu.dma_semaphore, #tpu.memory_space<semaphore_mem>>
    %17 = tpu.memref_squeeze %16 : memref<1x1x!tpu.dma_semaphore, #tpu.memory_space<semaphore_mem>> -> memref<!tpu.dma_semaphore, #tpu.memory_space<semaphore_mem>>
    tpu.enqueue_dma source(%14 : memref<2x1x128xf32, #tpu.memory_space<any>>) target(%15 : memref<2x1x128xf32, #tpu.memory_space<any>>) target_semaphore(%17 : memref<!tpu.dma_semaphore, #tpu.memory_space<semaphore_mem>>)
    %c2 = arith.constant 2 : index
    %18 = memref.load %arg1[%c2] : memref<8xi32, #tpu.memory_space<smem>>
    %c0_i32_26 = arith.constant 0 : i32
    %c2_i32 = arith.constant 2 : i32
    %c0_i32_27 = arith.constant 0 : i32
    %c2_i32_28 = arith.constant 2 : i32
    %c0_i32_29 = arith.constant 0 : i32
    %19 = tpu.memref_slice %arg4[%c0_i32_27, %c2_i32_28, %c0_i32_29] : memref<2x8x128xf32, #tpu.memory_space<any>> -> memref<2x1x128xf32, #tpu.memory_space<any>>
    %c0_i32_30 = arith.constant 0 : i32
    %c0_i32_31 = arith.constant 0 : i32
    %20 = tpu.memref_slice %arg6[%c0_i32_30, %18, %c0_i32_31] : memref<2x16x128xf32, #tpu.memory_space<any>> -> memref<2x1x128xf32, #tpu.memory_space<any>>
    %21 = tpu.memref_slice %arg8[%c0_i32_26, %c2_i32] : memref<2x8x!tpu.dma_semaphore, #tpu.memory_space<semaphore_mem>> -> memref<1x1x!tpu.dma_semaphore, #tpu.memory_space<semaphore_mem>>
    %22 = tpu.memref_squeeze %21 : memref<1x1x!tpu.dma_semaphore, #tpu.memory_space<semaphore_mem>> -> memref<!tpu.dma_semaphore, #tpu.memory_space<semaphore_mem>>
    tpu.enqueue_dma source(%19 : memref<2x1x128xf32, #tpu.memory_space<any>>) target(%20 : memref<2x1x128xf32, #tpu.memory_space<any>>) target_semaphore(%22 : memref<!tpu.dma_semaphore, #tpu.memory_space<semaphore_mem>>)
    %c1_i32_32 = arith.constant 1 : i32
    %c2_i32_33 = arith.constant 2 : i32
    %c0_i32_34 = arith.constant 0 : i32
    %c2_i32_35 = arith.constant 2 : i32
    %c0_i32_36 = arith.constant 0 : i32
    %23 = tpu.memref_slice %arg5[%c0_i32_34, %c2_i32_35, %c0_i32_36] : memref<2x8x128xf32, #tpu.memory_space<any>> -> memref<2x1x128xf32, #tpu.memory_space<any>>
    %c0_i32_37 = arith.constant 0 : i32
    %c0_i32_38 = arith.constant 0 : i32
    %24 = tpu.memref_slice %arg7[%c0_i32_37, %18, %c0_i32_38] : memref<2x16x128xf32, #tpu.memory_space<any>> -> memref<2x1x128xf32, #tpu.memory_space<any>>
    %25 = tpu.memref_slice %arg8[%c1_i32_32, %c2_i32_33] : memref<2x8x!tpu.dma_semaphore, #tpu.memory_space<semaphore_mem>> -> memref<1x1x!tpu.dma_semaphore, #tpu.memory_space<semaphore_mem>>
    %26 = tpu.memref_squeeze %25 : memref<1x1x!tpu.dma_semaphore, #tpu.memory_space<semaphore_mem>> -> memref<!tpu.dma_semaphore, #tpu.memory_space<semaphore_mem>>
    tpu.enqueue_dma source(%23 : memref<2x1x128xf32, #tpu.memory_space<any>>) target(%24 : memref<2x1x128xf32, #tpu.memory_space<any>>) target_semaphore(%26 : memref<!tpu.dma_semaphore, #tpu.memory_space<semaphore_mem>>)
    %c3 = arith.constant 3 : index
    %27 = memref.load %arg1[%c3] : memref<8xi32, #tpu.memory_space<smem>>
    %c0_i32_39 = arith.constant 0 : i32
    %c3_i32 = arith.constant 3 : i32
    %c0_i32_40 = arith.constant 0 : i32
    %c3_i32_41 = arith.constant 3 : i32
    %c0_i32_42 = arith.constant 0 : i32
    %28 = tpu.memref_slice %arg4[%c0_i32_40, %c3_i32_41, %c0_i32_42] : memref<2x8x128xf32, #tpu.memory_space<any>> -> memref<2x1x128xf32, #tpu.memory_space<any>>
    %c0_i32_43 = arith.constant 0 : i32
    %c0_i32_44 = arith.constant 0 : i32
    %29 = tpu.memref_slice %arg6[%c0_i32_43, %27, %c0_i32_44] : memref<2x16x128xf32, #tpu.memory_space<any>> -> memref<2x1x128xf32, #tpu.memory_space<any>>
    %30 = tpu.memref_slice %arg8[%c0_i32_39, %c3_i32] : memref<2x8x!tpu.dma_semaphore, #tpu.memory_space<semaphore_mem>> -> memref<1x1x!tpu.dma_semaphore, #tpu.memory_space<semaphore_mem>>
    %31 = tpu.memref_squeeze %30 : memref<1x1x!tpu.dma_semaphore, #tpu.memory_space<semaphore_mem>> -> memref<!tpu.dma_semaphore, #tpu.memory_space<semaphore_mem>>
    tpu.enqueue_dma source(%28 : memref<2x1x128xf32, #tpu.memory_space<any>>) target(%29 : memref<2x1x128xf32, #tpu.memory_space<any>>) target_semaphore(%31 : memref<!tpu.dma_semaphore, #tpu.memory_space<semaphore_mem>>)
    %c1_i32_45 = arith.constant 1 : i32
    %c3_i32_46 = arith.constant 3 : i32
    %c0_i32_47 = arith.constant 0 : i32
    %c3_i32_48 = arith.constant 3 : i32
    %c0_i32_49 = arith.constant 0 : i32
    %32 = tpu.memref_slice %arg5[%c0_i32_47, %c3_i32_48, %c0_i32_49] : memref<2x8x128xf32, #tpu.memory_space<any>> -> memref<2x1x128xf32, #tpu.memory_space<any>>
    %c0_i32_50 = arith.constant 0 : i32
    %c0_i32_51 = arith.constant 0 : i32
    %33 = tpu.memref_slice %arg7[%c0_i32_50, %27, %c0_i32_51] : memref<2x16x128xf32, #tpu.memory_space<any>> -> memref<2x1x128xf32, #tpu.memory_space<any>>
    %34 = tpu.memref_slice %arg8[%c1_i32_45, %c3_i32_46] : memref<2x8x!tpu.dma_semaphore, #tpu.memory_space<semaphore_mem>> -> memref<1x1x!tpu.dma_semaphore, #tpu.memory_space<semaphore_mem>>
    %35 = tpu.memref_squeeze %34 : memref<1x1x!tpu.dma_semaphore, #tpu.memory_space<semaphore_mem>> -> memref<!tpu.dma_semaphore, #tpu.memory_space<semaphore_mem>>
    tpu.enqueue_dma source(%32 : memref<2x1x128xf32, #tpu.memory_space<any>>) target(%33 : memref<2x1x128xf32, #tpu.memory_space<any>>) target_semaphore(%35 : memref<!tpu.dma_semaphore, #tpu.memory_space<semaphore_mem>>)
    %c4 = arith.constant 4 : index
    %36 = memref.load %arg1[%c4] : memref<8xi32, #tpu.memory_space<smem>>
    %c0_i32_52 = arith.constant 0 : i32
    %c4_i32 = arith.constant 4 : i32
    %c0_i32_53 = arith.constant 0 : i32
    %c4_i32_54 = arith.constant 4 : i32
    %c0_i32_55 = arith.constant 0 : i32
    %37 = tpu.memref_slice %arg4[%c0_i32_53, %c4_i32_54, %c0_i32_55] : memref<2x8x128xf32, #tpu.memory_space<any>> -> memref<2x1x128xf32, #tpu.memory_space<any>>
    %c0_i32_56 = arith.constant 0 : i32
    %c0_i32_57 = arith.constant 0 : i32
    %38 = tpu.memref_slice %arg6[%c0_i32_56, %36, %c0_i32_57] : memref<2x16x128xf32, #tpu.memory_space<any>> -> memref<2x1x128xf32, #tpu.memory_space<any>>
    %39 = tpu.memref_slice %arg8[%c0_i32_52, %c4_i32] : memref<2x8x!tpu.dma_semaphore, #tpu.memory_space<semaphore_mem>> -> memref<1x1x!tpu.dma_semaphore, #tpu.memory_space<semaphore_mem>>
    %40 = tpu.memref_squeeze %39 : memref<1x1x!tpu.dma_semaphore, #tpu.memory_space<semaphore_mem>> -> memref<!tpu.dma_semaphore, #tpu.memory_space<semaphore_mem>>
    tpu.enqueue_dma source(%37 : memref<2x1x128xf32, #tpu.memory_space<any>>) target(%38 : memref<2x1x128xf32, #tpu.memory_space<any>>) target_semaphore(%40 : memref<!tpu.dma_semaphore, #tpu.memory_space<semaphore_mem>>)
    %c1_i32_58 = arith.constant 1 : i32
    %c4_i32_59 = arith.constant 4 : i32
    %c0_i32_60 = arith.constant 0 : i32
    %c4_i32_61 = arith.constant 4 : i32
    %c0_i32_62 = arith.constant 0 : i32
    %41 = tpu.memref_slice %arg5[%c0_i32_60, %c4_i32_61, %c0_i32_62] : memref<2x8x128xf32, #tpu.memory_space<any>> -> memref<2x1x128xf32, #tpu.memory_space<any>>
    %c0_i32_63 = arith.constant 0 : i32
    %c0_i32_64 = arith.constant 0 : i32
    %42 = tpu.memref_slice %arg7[%c0_i32_63, %36, %c0_i32_64] : memref<2x16x128xf32, #tpu.memory_space<any>> -> memref<2x1x128xf32, #tpu.memory_space<any>>
    %43 = tpu.memref_slice %arg8[%c1_i32_58, %c4_i32_59] : memref<2x8x!tpu.dma_semaphore, #tpu.memory_space<semaphore_mem>> -> memref<1x1x!tpu.dma_semaphore, #tpu.memory_space<semaphore_mem>>
    %44 = tpu.memref_squeeze %43 : memref<1x1x!tpu.dma_semaphore, #tpu.memory_space<semaphore_mem>> -> memref<!tpu.dma_semaphore, #tpu.memory_space<semaphore_mem>>
    tpu.enqueue_dma source(%41 : memref<2x1x128xf32, #tpu.memory_space<any>>) target(%42 : memref<2x1x128xf32, #tpu.memory_space<any>>) target_semaphore(%44 : memref<!tpu.dma_semaphore, #tpu.memory_space<semaphore_mem>>)
    %c5 = arith.constant 5 : index
    %45 = memref.load %arg1[%c5] : memref<8xi32, #tpu.memory_space<smem>>
    %c0_i32_65 = arith.constant 0 : i32
    %c5_i32 = arith.constant 5 : i32
    %c0_i32_66 = arith.constant 0 : i32
    %c5_i32_67 = arith.constant 5 : i32
    %c0_i32_68 = arith.constant 0 : i32
    %46 = tpu.memref_slice %arg4[%c0_i32_66, %c5_i32_67, %c0_i32_68] : memref<2x8x128xf32, #tpu.memory_space<any>> -> memref<2x1x128xf32, #tpu.memory_space<any>>
    %c0_i32_69 = arith.constant 0 : i32
    %c0_i32_70 = arith.constant 0 : i32
    %47 = tpu.memref_slice %arg6[%c0_i32_69, %45, %c0_i32_70] : memref<2x16x128xf32, #tpu.memory_space<any>> -> memref<2x1x128xf32, #tpu.memory_space<any>>
    %48 = tpu.memref_slice %arg8[%c0_i32_65, %c5_i32] : memref<2x8x!tpu.dma_semaphore, #tpu.memory_space<semaphore_mem>> -> memref<1x1x!tpu.dma_semaphore, #tpu.memory_space<semaphore_mem>>
    %49 = tpu.memref_squeeze %48 : memref<1x1x!tpu.dma_semaphore, #tpu.memory_space<semaphore_mem>> -> memref<!tpu.dma_semaphore, #tpu.memory_space<semaphore_mem>>
    tpu.enqueue_dma source(%46 : memref<2x1x128xf32, #tpu.memory_space<any>>) target(%47 : memref<2x1x128xf32, #tpu.memory_space<any>>) target_semaphore(%49 : memref<!tpu.dma_semaphore, #tpu.memory_space<semaphore_mem>>)
    %c1_i32_71 = arith.constant 1 : i32
    %c5_i32_72 = arith.constant 5 : i32
    %c0_i32_73 = arith.constant 0 : i32
    %c5_i32_74 = arith.constant 5 : i32
    %c0_i32_75 = arith.constant 0 : i32
    %50 = tpu.memref_slice %arg5[%c0_i32_73, %c5_i32_74, %c0_i32_75] : memref<2x8x128xf32, #tpu.memory_space<any>> -> memref<2x1x128xf32, #tpu.memory_space<any>>
    %c0_i32_76 = arith.constant 0 : i32
    %c0_i32_77 = arith.constant 0 : i32
    %51 = tpu.memref_slice %arg7[%c0_i32_76, %45, %c0_i32_77] : memref<2x16x128xf32, #tpu.memory_space<any>> -> memref<2x1x128xf32, #tpu.memory_space<any>>
    %52 = tpu.memref_slice %arg8[%c1_i32_71, %c5_i32_72] : memref<2x8x!tpu.dma_semaphore, #tpu.memory_space<semaphore_mem>> -> memref<1x1x!tpu.dma_semaphore, #tpu.memory_space<semaphore_mem>>
    %53 = tpu.memref_squeeze %52 : memref<1x1x!tpu.dma_semaphore, #tpu.memory_space<semaphore_mem>> -> memref<!tpu.dma_semaphore, #tpu.memory_space<semaphore_mem>>
    tpu.enqueue_dma source(%50 : memref<2x1x128xf32, #tpu.memory_space<any>>) target(%51 : memref<2x1x128xf32, #tpu.memory_space<any>>) target_semaphore(%53 : memref<!tpu.dma_semaphore, #tpu.memory_space<semaphore_mem>>)
    %c6 = arith.constant 6 : index
    %54 = memref.load %arg1[%c6] : memref<8xi32, #tpu.memory_space<smem>>
    %c0_i32_78 = arith.constant 0 : i32
    %c6_i32 = arith.constant 6 : i32
    %c0_i32_79 = arith.constant 0 : i32
    %c6_i32_80 = arith.constant 6 : i32
    %c0_i32_81 = arith.constant 0 : i32
    %55 = tpu.memref_slice %arg4[%c0_i32_79, %c6_i32_80, %c0_i32_81] : memref<2x8x128xf32, #tpu.memory_space<any>> -> memref<2x1x128xf32, #tpu.memory_space<any>>
    %c0_i32_82 = arith.constant 0 : i32
    %c0_i32_83 = arith.constant 0 : i32
    %56 = tpu.memref_slice %arg6[%c0_i32_82, %54, %c0_i32_83] : memref<2x16x128xf32, #tpu.memory_space<any>> -> memref<2x1x128xf32, #tpu.memory_space<any>>
    %57 = tpu.memref_slice %arg8[%c0_i32_78, %c6_i32] : memref<2x8x!tpu.dma_semaphore, #tpu.memory_space<semaphore_mem>> -> memref<1x1x!tpu.dma_semaphore, #tpu.memory_space<semaphore_mem>>
    %58 = tpu.memref_squeeze %57 : memref<1x1x!tpu.dma_semaphore, #tpu.memory_space<semaphore_mem>> -> memref<!tpu.dma_semaphore, #tpu.memory_space<semaphore_mem>>
    tpu.enqueue_dma source(%55 : memref<2x1x128xf32, #tpu.memory_space<any>>) target(%56 : memref<2x1x128xf32, #tpu.memory_space<any>>) target_semaphore(%58 : memref<!tpu.dma_semaphore, #tpu.memory_space<semaphore_mem>>)
    %c1_i32_84 = arith.constant 1 : i32
    %c6_i32_85 = arith.constant 6 : i32
    %c0_i32_86 = arith.constant 0 : i32
    %c6_i32_87 = arith.constant 6 : i32
    %c0_i32_88 = arith.constant 0 : i32
    %59 = tpu.memref_slice %arg5[%c0_i32_86, %c6_i32_87, %c0_i32_88] : memref<2x8x128xf32, #tpu.memory_space<any>> -> memref<2x1x128xf32, #tpu.memory_space<any>>
    %c0_i32_89 = arith.constant 0 : i32
    %c0_i32_90 = arith.constant 0 : i32
    %60 = tpu.memref_slice %arg7[%c0_i32_89, %54, %c0_i32_90] : memref<2x16x128xf32, #tpu.memory_space<any>> -> memref<2x1x128xf32, #tpu.memory_space<any>>
    %61 = tpu.memref_slice %arg8[%c1_i32_84, %c6_i32_85] : memref<2x8x!tpu.dma_semaphore, #tpu.memory_space<semaphore_mem>> -> memref<1x1x!tpu.dma_semaphore, #tpu.memory_space<semaphore_mem>>
    %62 = tpu.memref_squeeze %61 : memref<1x1x!tpu.dma_semaphore, #tpu.memory_space<semaphore_mem>> -> memref<!tpu.dma_semaphore, #tpu.memory_space<semaphore_mem>>
    tpu.enqueue_dma source(%59 : memref<2x1x128xf32, #tpu.memory_space<any>>) target(%60 : memref<2x1x128xf32, #tpu.memory_space<any>>) target_semaphore(%62 : memref<!tpu.dma_semaphore, #tpu.memory_space<semaphore_mem>>)
    %c7 = arith.constant 7 : index
    %63 = memref.load %arg1[%c7] : memref<8xi32, #tpu.memory_space<smem>>
    %c0_i32_91 = arith.constant 0 : i32
    %c7_i32 = arith.constant 7 : i32
    %c0_i32_92 = arith.constant 0 : i32
    %c7_i32_93 = arith.constant 7 : i32
    %c0_i32_94 = arith.constant 0 : i32
    %64 = tpu.memref_slice %arg4[%c0_i32_92, %c7_i32_93, %c0_i32_94] : memref<2x8x128xf32, #tpu.memory_space<any>> -> memref<2x1x128xf32, #tpu.memory_space<any>>
    %c0_i32_95 = arith.constant 0 : i32
    %c0_i32_96 = arith.constant 0 : i32
    %65 = tpu.memref_slice %arg6[%c0_i32_95, %63, %c0_i32_96] : memref<2x16x128xf32, #tpu.memory_space<any>> -> memref<2x1x128xf32, #tpu.memory_space<any>>
    %66 = tpu.memref_slice %arg8[%c0_i32_91, %c7_i32] : memref<2x8x!tpu.dma_semaphore, #tpu.memory_space<semaphore_mem>> -> memref<1x1x!tpu.dma_semaphore, #tpu.memory_space<semaphore_mem>>
    %67 = tpu.memref_squeeze %66 : memref<1x1x!tpu.dma_semaphore, #tpu.memory_space<semaphore_mem>> -> memref<!tpu.dma_semaphore, #tpu.memory_space<semaphore_mem>>
    tpu.enqueue_dma source(%64 : memref<2x1x128xf32, #tpu.memory_space<any>>) target(%65 : memref<2x1x128xf32, #tpu.memory_space<any>>) target_semaphore(%67 : memref<!tpu.dma_semaphore, #tpu.memory_space<semaphore_mem>>)
    %c1_i32_97 = arith.constant 1 : i32
    %c7_i32_98 = arith.constant 7 : i32
    %c0_i32_99 = arith.constant 0 : i32
    %c7_i32_100 = arith.constant 7 : i32
    %c0_i32_101 = arith.constant 0 : i32
    %68 = tpu.memref_slice %arg5[%c0_i32_99, %c7_i32_100, %c0_i32_101] : memref<2x8x128xf32, #tpu.memory_space<any>> -> memref<2x1x128xf32, #tpu.memory_space<any>>
    %c0_i32_102 = arith.constant 0 : i32
    %c0_i32_103 = arith.constant 0 : i32
    %69 = tpu.memref_slice %arg7[%c0_i32_102, %63, %c0_i32_103] : memref<2x16x128xf32, #tpu.memory_space<any>> -> memref<2x1x128xf32, #tpu.memory_space<any>>
    %70 = tpu.memref_slice %arg8[%c1_i32_97, %c7_i32_98] : memref<2x8x!tpu.dma_semaphore, #tpu.memory_space<semaphore_mem>> -> memref<1x1x!tpu.dma_semaphore, #tpu.memory_space<semaphore_mem>>
    %71 = tpu.memref_squeeze %70 : memref<1x1x!tpu.dma_semaphore, #tpu.memory_space<semaphore_mem>> -> memref<!tpu.dma_semaphore, #tpu.memory_space<semaphore_mem>>
    tpu.enqueue_dma source(%68 : memref<2x1x128xf32, #tpu.memory_space<any>>) target(%69 : memref<2x1x128xf32, #tpu.memory_space<any>>) target_semaphore(%71 : memref<!tpu.dma_semaphore, #tpu.memory_space<semaphore_mem>>)
    %c0_i32_104 = arith.constant 0 : i32
    %c0_i32_105 = arith.constant 0 : i32
    %c0_i32_106 = arith.constant 0 : i32
    %c0_i32_107 = arith.constant 0 : i32
    %c0_i32_108 = arith.constant 0 : i32
    %72 = tpu.memref_slice %arg4[%c0_i32_106, %c0_i32_107, %c0_i32_108] : memref<2x8x128xf32, #tpu.memory_space<any>> -> memref<2x1x128xf32, #tpu.memory_space<any>>
    %c0_i32_109 = arith.constant 0 : i32
    %c0_i32_110 = arith.constant 0 : i32
    %73 = tpu.memref_slice %arg6[%c0_i32_109, %0, %c0_i32_110] : memref<2x16x128xf32, #tpu.memory_space<any>> -> memref<2x1x128xf32, #tpu.memory_space<any>>
    %74 = tpu.memref_slice %arg8[%c0_i32_104, %c0_i32_105] : memref<2x8x!tpu.dma_semaphore, #tpu.memory_space<semaphore_mem>> -> memref<1x1x!tpu.dma_semaphore, #tpu.memory_space<semaphore_mem>>
    %75 = tpu.memref_squeeze %74 : memref<1x1x!tpu.dma_semaphore, #tpu.memory_space<semaphore_mem>> -> memref<!tpu.dma_semaphore, #tpu.memory_space<semaphore_mem>>
    tpu.wait_dma2 semaphore(%75 : memref<!tpu.dma_semaphore, #tpu.memory_space<semaphore_mem>>) src(%72 : memref<2x1x128xf32, #tpu.memory_space<any>>) dst(%73 : memref<2x1x128xf32, #tpu.memory_space<any>>)
    %c1_i32_111 = arith.constant 1 : i32
    %c0_i32_112 = arith.constant 0 : i32
    %c0_i32_113 = arith.constant 0 : i32
    %c0_i32_114 = arith.constant 0 : i32
    %c0_i32_115 = arith.constant 0 : i32
    %76 = tpu.memref_slice %arg5[%c0_i32_113, %c0_i32_114, %c0_i32_115] : memref<2x8x128xf32, #tpu.memory_space<any>> -> memref<2x1x128xf32, #tpu.memory_space<any>>
    %c0_i32_116 = arith.constant 0 : i32
    %c0_i32_117 = arith.constant 0 : i32
    %77 = tpu.memref_slice %arg7[%c0_i32_116, %0, %c0_i32_117] : memref<2x16x128xf32, #tpu.memory_space<any>> -> memref<2x1x128xf32, #tpu.memory_space<any>>
    %78 = tpu.memref_slice %arg8[%c1_i32_111, %c0_i32_112] : memref<2x8x!tpu.dma_semaphore, #tpu.memory_space<semaphore_mem>> -> memref<1x1x!tpu.dma_semaphore, #tpu.memory_space<semaphore_mem>>
    %79 = tpu.memref_squeeze %78 : memref<1x1x!tpu.dma_semaphore, #tpu.memory_space<semaphore_mem>> -> memref<!tpu.dma_semaphore, #tpu.memory_space<semaphore_mem>>
    tpu.wait_dma2 semaphore(%79 : memref<!tpu.dma_semaphore, #tpu.memory_space<semaphore_mem>>) src(%76 : memref<2x1x128xf32, #tpu.memory_space<any>>) dst(%77 : memref<2x1x128xf32, #tpu.memory_space<any>>)
    %c0_i32_118 = arith.constant 0 : i32
    %c1_i32_119 = arith.constant 1 : i32
    %c0_i32_120 = arith.constant 0 : i32
    %c1_i32_121 = arith.constant 1 : i32
    %c0_i32_122 = arith.constant 0 : i32
    %80 = tpu.memref_slice %arg4[%c0_i32_120, %c1_i32_121, %c0_i32_122] : memref<2x8x128xf32, #tpu.memory_space<any>> -> memref<2x1x128xf32, #tpu.memory_space<any>>
    %c0_i32_123 = arith.constant 0 : i32
    %c0_i32_124 = arith.constant 0 : i32
    %81 = tpu.memref_slice %arg6[%c0_i32_123, %9, %c0_i32_124] : memref<2x16x128xf32, #tpu.memory_space<any>> -> memref<2x1x128xf32, #tpu.memory_space<any>>
    %82 = tpu.memref_slice %arg8[%c0_i32_118, %c1_i32_119] : memref<2x8x!tpu.dma_semaphore, #tpu.memory_space<semaphore_mem>> -> memref<1x1x!tpu.dma_semaphore, #tpu.memory_space<semaphore_mem>>
    %83 = tpu.memref_squeeze %82 : memref<1x1x!tpu.dma_semaphore, #tpu.memory_space<semaphore_mem>> -> memref<!tpu.dma_semaphore, #tpu.memory_space<semaphore_mem>>
    tpu.wait_dma2 semaphore(%83 : memref<!tpu.dma_semaphore, #tpu.memory_space<semaphore_mem>>) src(%80 : memref<2x1x128xf32, #tpu.memory_space<any>>) dst(%81 : memref<2x1x128xf32, #tpu.memory_space<any>>)
    %c1_i32_125 = arith.constant 1 : i32
    %c1_i32_126 = arith.constant 1 : i32
    %c0_i32_127 = arith.constant 0 : i32
    %c1_i32_128 = arith.constant 1 : i32
    %c0_i32_129 = arith.constant 0 : i32
    %84 = tpu.memref_slice %arg5[%c0_i32_127, %c1_i32_128, %c0_i32_129] : memref<2x8x128xf32, #tpu.memory_space<any>> -> memref<2x1x128xf32, #tpu.memory_space<any>>
    %c0_i32_130 = arith.constant 0 : i32
    %c0_i32_131 = arith.constant 0 : i32
    %85 = tpu.memref_slice %arg7[%c0_i32_130, %9, %c0_i32_131] : memref<2x16x128xf32, #tpu.memory_space<any>> -> memref<2x1x128xf32, #tpu.memory_space<any>>
    %86 = tpu.memref_slice %arg8[%c1_i32_125, %c1_i32_126] : memref<2x8x!tpu.dma_semaphore, #tpu.memory_space<semaphore_mem>> -> memref<1x1x!tpu.dma_semaphore, #tpu.memory_space<semaphore_mem>>
    %87 = tpu.memref_squeeze %86 : memref<1x1x!tpu.dma_semaphore, #tpu.memory_space<semaphore_mem>> -> memref<!tpu.dma_semaphore, #tpu.memory_space<semaphore_mem>>
    tpu.wait_dma2 semaphore(%87 : memref<!tpu.dma_semaphore, #tpu.memory_space<semaphore_mem>>) src(%84 : memref<2x1x128xf32, #tpu.memory_space<any>>) dst(%85 : memref<2x1x128xf32, #tpu.memory_space<any>>)
    %c0_i32_132 = arith.constant 0 : i32
    %c2_i32_133 = arith.constant 2 : i32
    %c0_i32_134 = arith.constant 0 : i32
    %c2_i32_135 = arith.constant 2 : i32
    %c0_i32_136 = arith.constant 0 : i32
    %88 = tpu.memref_slice %arg4[%c0_i32_134, %c2_i32_135, %c0_i32_136] : memref<2x8x128xf32, #tpu.memory_space<any>> -> memref<2x1x128xf32, #tpu.memory_space<any>>
    %c0_i32_137 = arith.constant 0 : i32
    %c0_i32_138 = arith.constant 0 : i32
    %89 = tpu.memref_slice %arg6[%c0_i32_137, %18, %c0_i32_138] : memref<2x16x128xf32, #tpu.memory_space<any>> -> memref<2x1x128xf32, #tpu.memory_space<any>>
    %90 = tpu.memref_slice %arg8[%c0_i32_132, %c2_i32_133] : memref<2x8x!tpu.dma_semaphore, #tpu.memory_space<semaphore_mem>> -> memref<1x1x!tpu.dma_semaphore, #tpu.memory_space<semaphore_mem>>
    %91 = tpu.memref_squeeze %90 : memref<1x1x!tpu.dma_semaphore, #tpu.memory_space<semaphore_mem>> -> memref<!tpu.dma_semaphore, #tpu.memory_space<semaphore_mem>>
    tpu.wait_dma2 semaphore(%91 : memref<!tpu.dma_semaphore, #tpu.memory_space<semaphore_mem>>) src(%88 : memref<2x1x128xf32, #tpu.memory_space<any>>) dst(%89 : memref<2x1x128xf32, #tpu.memory_space<any>>)
    %c1_i32_139 = arith.constant 1 : i32
    %c2_i32_140 = arith.constant 2 : i32
    %c0_i32_141 = arith.constant 0 : i32
    %c2_i32_142 = arith.constant 2 : i32
    %c0_i32_143 = arith.constant 0 : i32
    %92 = tpu.memref_slice %arg5[%c0_i32_141, %c2_i32_142, %c0_i32_143] : memref<2x8x128xf32, #tpu.memory_space<any>> -> memref<2x1x128xf32, #tpu.memory_space<any>>
    %c0_i32_144 = arith.constant 0 : i32
    %c0_i32_145 = arith.constant 0 : i32
    %93 = tpu.memref_slice %arg7[%c0_i32_144, %18, %c0_i32_145] : memref<2x16x128xf32, #tpu.memory_space<any>> -> memref<2x1x128xf32, #tpu.memory_space<any>>
    %94 = tpu.memref_slice %arg8[%c1_i32_139, %c2_i32_140] : memref<2x8x!tpu.dma_semaphore, #tpu.memory_space<semaphore_mem>> -> memref<1x1x!tpu.dma_semaphore, #tpu.memory_space<semaphore_mem>>
    %95 = tpu.memref_squeeze %94 : memref<1x1x!tpu.dma_semaphore, #tpu.memory_space<semaphore_mem>> -> memref<!tpu.dma_semaphore, #tpu.memory_space<semaphore_mem>>
    tpu.wait_dma2 semaphore(%95 : memref<!tpu.dma_semaphore, #tpu.memory_space<semaphore_mem>>) src(%92 : memref<2x1x128xf32, #tpu.memory_space<any>>) dst(%93 : memref<2x1x128xf32, #tpu.memory_space<any>>)
    %c0_i32_146 = arith.constant 0 : i32
    %c3_i32_147 = arith.constant 3 : i32
    %c0_i32_148 = arith.constant 0 : i32
    %c3_i32_149 = arith.constant 3 : i32
    %c0_i32_150 = arith.constant 0 : i32
    %96 = tpu.memref_slice %arg4[%c0_i32_148, %c3_i32_149, %c0_i32_150] : memref<2x8x128xf32, #tpu.memory_space<any>> -> memref<2x1x128xf32, #tpu.memory_space<any>>
    %c0_i32_151 = arith.constant 0 : i32
    %c0_i32_152 = arith.constant 0 : i32
    %97 = tpu.memref_slice %arg6[%c0_i32_151, %27, %c0_i32_152] : memref<2x16x128xf32, #tpu.memory_space<any>> -> memref<2x1x128xf32, #tpu.memory_space<any>>
    %98 = tpu.memref_slice %arg8[%c0_i32_146, %c3_i32_147] : memref<2x8x!tpu.dma_semaphore, #tpu.memory_space<semaphore_mem>> -> memref<1x1x!tpu.dma_semaphore, #tpu.memory_space<semaphore_mem>>
    %99 = tpu.memref_squeeze %98 : memref<1x1x!tpu.dma_semaphore, #tpu.memory_space<semaphore_mem>> -> memref<!tpu.dma_semaphore, #tpu.memory_space<semaphore_mem>>
    tpu.wait_dma2 semaphore(%99 : memref<!tpu.dma_semaphore, #tpu.memory_space<semaphore_mem>>) src(%96 : memref<2x1x128xf32, #tpu.memory_space<any>>) dst(%97 : memref<2x1x128xf32, #tpu.memory_space<any>>)
    %c1_i32_153 = arith.constant 1 : i32
    %c3_i32_154 = arith.constant 3 : i32
    %c0_i32_155 = arith.constant 0 : i32
    %c3_i32_156 = arith.constant 3 : i32
    %c0_i32_157 = arith.constant 0 : i32
    %100 = tpu.memref_slice %arg5[%c0_i32_155, %c3_i32_156, %c0_i32_157] : memref<2x8x128xf32, #tpu.memory_space<any>> -> memref<2x1x128xf32, #tpu.memory_space<any>>
    %c0_i32_158 = arith.constant 0 : i32
    %c0_i32_159 = arith.constant 0 : i32
    %101 = tpu.memref_slice %arg7[%c0_i32_158, %27, %c0_i32_159] : memref<2x16x128xf32, #tpu.memory_space<any>> -> memref<2x1x128xf32, #tpu.memory_space<any>>
    %102 = tpu.memref_slice %arg8[%c1_i32_153, %c3_i32_154] : memref<2x8x!tpu.dma_semaphore, #tpu.memory_space<semaphore_mem>> -> memref<1x1x!tpu.dma_semaphore, #tpu.memory_space<semaphore_mem>>
    %103 = tpu.memref_squeeze %102 : memref<1x1x!tpu.dma_semaphore, #tpu.memory_space<semaphore_mem>> -> memref<!tpu.dma_semaphore, #tpu.memory_space<semaphore_mem>>
    tpu.wait_dma2 semaphore(%103 : memref<!tpu.dma_semaphore, #tpu.memory_space<semaphore_mem>>) src(%100 : memref<2x1x128xf32, #tpu.memory_space<any>>) dst(%101 : memref<2x1x128xf32, #tpu.memory_space<any>>)
    %c0_i32_160 = arith.constant 0 : i32
    %c4_i32_161 = arith.constant 4 : i32
    %c0_i32_162 = arith.constant 0 : i32
    %c4_i32_163 = arith.constant 4 : i32
    %c0_i32_164 = arith.constant 0 : i32
    %104 = tpu.memref_slice %arg4[%c0_i32_162, %c4_i32_163, %c0_i32_164] : memref<2x8x128xf32, #tpu.memory_space<any>> -> memref<2x1x128xf32, #tpu.memory_space<any>>
    %c0_i32_165 = arith.constant 0 : i32
    %c0_i32_166 = arith.constant 0 : i32
    %105 = tpu.memref_slice %arg6[%c0_i32_165, %36, %c0_i32_166] : memref<2x16x128xf32, #tpu.memory_space<any>> -> memref<2x1x128xf32, #tpu.memory_space<any>>
    %106 = tpu.memref_slice %arg8[%c0_i32_160, %c4_i32_161] : memref<2x8x!tpu.dma_semaphore, #tpu.memory_space<semaphore_mem>> -> memref<1x1x!tpu.dma_semaphore, #tpu.memory_space<semaphore_mem>>
    %107 = tpu.memref_squeeze %106 : memref<1x1x!tpu.dma_semaphore, #tpu.memory_space<semaphore_mem>> -> memref<!tpu.dma_semaphore, #tpu.memory_space<semaphore_mem>>
    tpu.wait_dma2 semaphore(%107 : memref<!tpu.dma_semaphore, #tpu.memory_space<semaphore_mem>>) src(%104 : memref<2x1x128xf32, #tpu.memory_space<any>>) dst(%105 : memref<2x1x128xf32, #tpu.memory_space<any>>)
    %c1_i32_167 = arith.constant 1 : i32
    %c4_i32_168 = arith.constant 4 : i32
    %c0_i32_169 = arith.constant 0 : i32
    %c4_i32_170 = arith.constant 4 : i32
    %c0_i32_171 = arith.constant 0 : i32
    %108 = tpu.memref_slice %arg5[%c0_i32_169, %c4_i32_170, %c0_i32_171] : memref<2x8x128xf32, #tpu.memory_space<any>> -> memref<2x1x128xf32, #tpu.memory_space<any>>
    %c0_i32_172 = arith.constant 0 : i32
    %c0_i32_173 = arith.constant 0 : i32
    %109 = tpu.memref_slice %arg7[%c0_i32_172, %36, %c0_i32_173] : memref<2x16x128xf32, #tpu.memory_space<any>> -> memref<2x1x128xf32, #tpu.memory_space<any>>
    %110 = tpu.memref_slice %arg8[%c1_i32_167, %c4_i32_168] : memref<2x8x!tpu.dma_semaphore, #tpu.memory_space<semaphore_mem>> -> memref<1x1x!tpu.dma_semaphore, #tpu.memory_space<semaphore_mem>>
    %111 = tpu.memref_squeeze %110 : memref<1x1x!tpu.dma_semaphore, #tpu.memory_space<semaphore_mem>> -> memref<!tpu.dma_semaphore, #tpu.memory_space<semaphore_mem>>
    tpu.wait_dma2 semaphore(%111 : memref<!tpu.dma_semaphore, #tpu.memory_space<semaphore_mem>>) src(%108 : memref<2x1x128xf32, #tpu.memory_space<any>>) dst(%109 : memref<2x1x128xf32, #tpu.memory_space<any>>)
    %c0_i32_174 = arith.constant 0 : i32
    %c5_i32_175 = arith.constant 5 : i32
    %c0_i32_176 = arith.constant 0 : i32
    %c5_i32_177 = arith.constant 5 : i32
    %c0_i32_178 = arith.constant 0 : i32
    %112 = tpu.memref_slice %arg4[%c0_i32_176, %c5_i32_177, %c0_i32_178] : memref<2x8x128xf32, #tpu.memory_space<any>> -> memref<2x1x128xf32, #tpu.memory_space<any>>
    %c0_i32_179 = arith.constant 0 : i32
    %c0_i32_180 = arith.constant 0 : i32
    %113 = tpu.memref_slice %arg6[%c0_i32_179, %45, %c0_i32_180] : memref<2x16x128xf32, #tpu.memory_space<any>> -> memref<2x1x128xf32, #tpu.memory_space<any>>
    %114 = tpu.memref_slice %arg8[%c0_i32_174, %c5_i32_175] : memref<2x8x!tpu.dma_semaphore, #tpu.memory_space<semaphore_mem>> -> memref<1x1x!tpu.dma_semaphore, #tpu.memory_space<semaphore_mem>>
    %115 = tpu.memref_squeeze %114 : memref<1x1x!tpu.dma_semaphore, #tpu.memory_space<semaphore_mem>> -> memref<!tpu.dma_semaphore, #tpu.memory_space<semaphore_mem>>
    tpu.wait_dma2 semaphore(%115 : memref<!tpu.dma_semaphore, #tpu.memory_space<semaphore_mem>>) src(%112 : memref<2x1x128xf32, #tpu.memory_space<any>>) dst(%113 : memref<2x1x128xf32, #tpu.memory_space<any>>)
    %c1_i32_181 = arith.constant 1 : i32
    %c5_i32_182 = arith.constant 5 : i32
    %c0_i32_183 = arith.constant 0 : i32
    %c5_i32_184 = arith.constant 5 : i32
    %c0_i32_185 = arith.constant 0 : i32
    %116 = tpu.memref_slice %arg5[%c0_i32_183, %c5_i32_184, %c0_i32_185] : memref<2x8x128xf32, #tpu.memory_space<any>> -> memref<2x1x128xf32, #tpu.memory_space<any>>
    %c0_i32_186 = arith.constant 0 : i32
    %c0_i32_187 = arith.constant 0 : i32
    %117 = tpu.memref_slice %arg7[%c0_i32_186, %45, %c0_i32_187] : memref<2x16x128xf32, #tpu.memory_space<any>> -> memref<2x1x128xf32, #tpu.memory_space<any>>
    %118 = tpu.memref_slice %arg8[%c1_i32_181, %c5_i32_182] : memref<2x8x!tpu.dma_semaphore, #tpu.memory_space<semaphore_mem>> -> memref<1x1x!tpu.dma_semaphore, #tpu.memory_space<semaphore_mem>>
    %119 = tpu.memref_squeeze %118 : memref<1x1x!tpu.dma_semaphore, #tpu.memory_space<semaphore_mem>> -> memref<!tpu.dma_semaphore, #tpu.memory_space<semaphore_mem>>
    tpu.wait_dma2 semaphore(%119 : memref<!tpu.dma_semaphore, #tpu.memory_space<semaphore_mem>>) src(%116 : memref<2x1x128xf32, #tpu.memory_space<any>>) dst(%117 : memref<2x1x128xf32, #tpu.memory_space<any>>)
    %c0_i32_188 = arith.constant 0 : i32
    %c6_i32_189 = arith.constant 6 : i32
    %c0_i32_190 = arith.constant 0 : i32
    %c6_i32_191 = arith.constant 6 : i32
    %c0_i32_192 = arith.constant 0 : i32
    %120 = tpu.memref_slice %arg4[%c0_i32_190, %c6_i32_191, %c0_i32_192] : memref<2x8x128xf32, #tpu.memory_space<any>> -> memref<2x1x128xf32, #tpu.memory_space<any>>
    %c0_i32_193 = arith.constant 0 : i32
    %c0_i32_194 = arith.constant 0 : i32
    %121 = tpu.memref_slice %arg6[%c0_i32_193, %54, %c0_i32_194] : memref<2x16x128xf32, #tpu.memory_space<any>> -> memref<2x1x128xf32, #tpu.memory_space<any>>
    %122 = tpu.memref_slice %arg8[%c0_i32_188, %c6_i32_189] : memref<2x8x!tpu.dma_semaphore, #tpu.memory_space<semaphore_mem>> -> memref<1x1x!tpu.dma_semaphore, #tpu.memory_space<semaphore_mem>>
    %123 = tpu.memref_squeeze %122 : memref<1x1x!tpu.dma_semaphore, #tpu.memory_space<semaphore_mem>> -> memref<!tpu.dma_semaphore, #tpu.memory_space<semaphore_mem>>
    tpu.wait_dma2 semaphore(%123 : memref<!tpu.dma_semaphore, #tpu.memory_space<semaphore_mem>>) src(%120 : memref<2x1x128xf32, #tpu.memory_space<any>>) dst(%121 : memref<2x1x128xf32, #tpu.memory_space<any>>)
    %c1_i32_195 = arith.constant 1 : i32
    %c6_i32_196 = arith.constant 6 : i32
    %c0_i32_197 = arith.constant 0 : i32
    %c6_i32_198 = arith.constant 6 : i32
    %c0_i32_199 = arith.constant 0 : i32
    %124 = tpu.memref_slice %arg5[%c0_i32_197, %c6_i32_198, %c0_i32_199] : memref<2x8x128xf32, #tpu.memory_space<any>> -> memref<2x1x128xf32, #tpu.memory_space<any>>
    %c0_i32_200 = arith.constant 0 : i32
    %c0_i32_201 = arith.constant 0 : i32
    %125 = tpu.memref_slice %arg7[%c0_i32_200, %54, %c0_i32_201] : memref<2x16x128xf32, #tpu.memory_space<any>> -> memref<2x1x128xf32, #tpu.memory_space<any>>
    %126 = tpu.memref_slice %arg8[%c1_i32_195, %c6_i32_196] : memref<2x8x!tpu.dma_semaphore, #tpu.memory_space<semaphore_mem>> -> memref<1x1x!tpu.dma_semaphore, #tpu.memory_space<semaphore_mem>>
    %127 = tpu.memref_squeeze %126 : memref<1x1x!tpu.dma_semaphore, #tpu.memory_space<semaphore_mem>> -> memref<!tpu.dma_semaphore, #tpu.memory_space<semaphore_mem>>
    tpu.wait_dma2 semaphore(%127 : memref<!tpu.dma_semaphore, #tpu.memory_space<semaphore_mem>>) src(%124 : memref<2x1x128xf32, #tpu.memory_space<any>>) dst(%125 : memref<2x1x128xf32, #tpu.memory_space<any>>)
    %c0_i32_202 = arith.constant 0 : i32
    %c7_i32_203 = arith.constant 7 : i32
    %c0_i32_204 = arith.constant 0 : i32
    %c7_i32_205 = arith.constant 7 : i32
    %c0_i32_206 = arith.constant 0 : i32
    %128 = tpu.memref_slice %arg4[%c0_i32_204, %c7_i32_205, %c0_i32_206] : memref<2x8x128xf32, #tpu.memory_space<any>> -> memref<2x1x128xf32, #tpu.memory_space<any>>
    %c0_i32_207 = arith.constant 0 : i32
    %c0_i32_208 = arith.constant 0 : i32
    %129 = tpu.memref_slice %arg6[%c0_i32_207, %63, %c0_i32_208] : memref<2x16x128xf32, #tpu.memory_space<any>> -> memref<2x1x128xf32, #tpu.memory_space<any>>
    %130 = tpu.memref_slice %arg8[%c0_i32_202, %c7_i32_203] : memref<2x8x!tpu.dma_semaphore, #tpu.memory_space<semaphore_mem>> -> memref<1x1x!tpu.dma_semaphore, #tpu.memory_space<semaphore_mem>>
    %131 = tpu.memref_squeeze %130 : memref<1x1x!tpu.dma_semaphore, #tpu.memory_space<semaphore_mem>> -> memref<!tpu.dma_semaphore, #tpu.memory_space<semaphore_mem>>
    tpu.wait_dma2 semaphore(%131 : memref<!tpu.dma_semaphore, #tpu.memory_space<semaphore_mem>>) src(%128 : memref<2x1x128xf32, #tpu.memory_space<any>>) dst(%129 : memref<2x1x128xf32, #tpu.memory_space<any>>)
    %c1_i32_209 = arith.constant 1 : i32
    %c7_i32_210 = arith.constant 7 : i32
    %c0_i32_211 = arith.constant 0 : i32
    %c7_i32_212 = arith.constant 7 : i32
    %c0_i32_213 = arith.constant 0 : i32
    %132 = tpu.memref_slice %arg5[%c0_i32_211, %c7_i32_212, %c0_i32_213] : memref<2x8x128xf32, #tpu.memory_space<any>> -> memref<2x1x128xf32, #tpu.memory_space<any>>
    %c0_i32_214 = arith.constant 0 : i32
    %c0_i32_215 = arith.constant 0 : i32
    %133 = tpu.memref_slice %arg7[%c0_i32_214, %63, %c0_i32_215] : memref<2x16x128xf32, #tpu.memory_space<any>> -> memref<2x1x128xf32, #tpu.memory_space<any>>
    %134 = tpu.memref_slice %arg8[%c1_i32_209, %c7_i32_210] : memref<2x8x!tpu.dma_semaphore, #tpu.memory_space<semaphore_mem>> -> memref<1x1x!tpu.dma_semaphore, #tpu.memory_space<semaphore_mem>>
    %135 = tpu.memref_squeeze %134 : memref<1x1x!tpu.dma_semaphore, #tpu.memory_space<semaphore_mem>> -> memref<!tpu.dma_semaphore, #tpu.memory_space<semaphore_mem>>
    tpu.wait_dma2 semaphore(%135 : memref<!tpu.dma_semaphore, #tpu.memory_space<semaphore_mem>>) src(%132 : memref<2x1x128xf32, #tpu.memory_space<any>>) dst(%133 : memref<2x1x128xf32, #tpu.memory_space<any>>)
    return
  }
}

</mosaic_0001>

<bundles_post_ra>
// kernel: kv_cache_update.1
= control target key start
LH: loop header
LB: loop body
LE: loop exit
PB: predicated region body
PF: predicated region fallthrough
CT: control target
= control target key end

     0   :  { %s1483_s0 = inlined_call_operand.vmem [shape: s32[8], index: 0, kind: input, shape index: {}]   ;;  %s1484_s1 = inlined_call_operand.vmem [shape: f32[2,16,128], index: 1, kind: input, shape index: {}, may-alias: {1,5}]   ;;  %s1485_s2 = inlined_call_operand.vmem [shape: f32[2,16,128], index: 2, kind: input, shape index: {}, may-alias: {2,6}]   ;;  %s1486_s3 = inlined_call_operand.vmem [shape: f32[2,8,128], index: 3, kind: input, shape index: {}]   ;;  %s1487_s4 = inlined_call_operand.vmem [shape: f32[2,8,128], index: 4, kind: input, shape index: {}]   ;;  %s1488_s5 = inlined_call_operand.vmem [shape: f32[2,16,128], index: 5, kind: output, shape index: {0}, may-alias: {1,5}]   ;;  %s1489_s6 = inlined_call_operand.vmem [shape: f32[2,16,128], index: 6, kind: output, shape index: {1}, may-alias: {2,6}]  }
   0x1   :  { %s12_s23 = sshll.u32 %s1483_s0, 4  ;;  %s13_s23 = int_to_ptr.vmem [resolvable:$true] %s12_s23 }
   0x2   :  { %s1254_s1 = scalar_lea.vmem %s13_s23, 16  ;;  %p1259_p1 = scmp.lt.s32.totalorder %s13_s23, %s13_s23 }
   0x3   :  { %p1255_p0 = scmp.ne.s32.totalorder %s13_s23, %s1254_s1  ;;  %p1260_p2 = scmp.lt.s32.totalorder %s1254_s1, %s1254_s1 }
   0x5   :  { %p1261_p3 = por %p1260_p2, %p1259_p1 }
   0x7   :  { %p1262_p4 = pnand %p1261_p3, %p1255_p0 }
   0x9   :  { %1265 = shalt.err (!%p1262_p4)  }
   0xa   :  { %s1300_s2 = smov [#allocation4]  }
   0xb   :  { %15 = dma.vmem_to_smem %s13_s23, 16, %s1300_s2, [#allocation3] }
   0xc   :  { %1266 = dma.done.wait [#allocation3], 16 }
   0xd   :  { %1267 = vsyncadd [#allocation3], 4294967280 }
   0xe   :  { %17 = sfence }
   0xf   :  { %s18_s24 = sld [smem:[#allocation4]]  ;;  %v37_v0 = vld [vmem:[%s1486_s3] sm:$0x1]  ;;  %v39_v1 = vld [vmem:[%s1486_s3 + $0x8] sm:$0x1] }
  0x15   :  { %s19_s30 = scalar_lea.vmem %s1488_s5, %s18_s24 }
  0x16   :  { %38 = vst [vmem:[%s19_s30] sm:$0x1] %v37_v0  ;;  %40 = vst [vmem:[%s19_s30 + $0x10] sm:$0x1] %v39_v1 }
  0x17   :  { %67 = vsyncadd [#allocation2], 32  ;;  %s68_s9 = scalar_lea.vmem %s1489_s6, %s18_s24  ;;  %v87_v2 = vld [vmem:[%s1487_s4] sm:$0x1]  ;;  %v89_v3 = vld [vmem:[%s1487_s4 + $0x8] sm:$0x1] }
  0x18   :  { %88 = vst [vmem:[%s68_s9] sm:$0x1] %v87_v2  ;;  %90 = vst [vmem:[%s68_s9 + $0x10] sm:$0x1] %v89_v3 }
  0x19   :  { %117 = vsyncadd [#allocation2 + $0x8], 32  ;;  %s1174_s14 = sld [smem:[#allocation4 + $0x1]]  ;;  %v1177_v4 = vld [vmem:[%s1486_s3 + $0x1] sm:$0x1] }
  0x1a   :  { %v1178_v5 = vld [vmem:[%s1486_s3 + $0x9] sm:$0x1] }
  0x1f   :  { %s120_s21 = scalar_lea.vmem %s1488_s5, %s1174_s14 }
  0x20   :  { %140 = vst [vmem:[%s120_s21] sm:$0x1] %v1177_v4  ;;  %142 = vst [vmem:[%s120_s21 + $0x10] sm:$0x1] %v1178_v5 }
  0x21   :  { %169 = vsyncadd [#allocation2 + $0x1], 32  ;;  %s171_s1 = scalar_lea.vmem %s1489_s6, %s1174_s14  ;;  %v1181_v6 = vld [vmem:[%s1487_s4 + $0x1] sm:$0x1]  ;;  %v1182_v7 = vld [vmem:[%s1487_s4 + $0x9] sm:$0x1] }
  0x22   :  { %191 = vst [vmem:[%s171_s1] sm:$0x1] %v1181_v6  ;;  %193 = vst [vmem:[%s171_s1 + $0x10] sm:$0x1] %v1182_v7 }
  0x23   :  { %220 = vsyncadd [#allocation2 + $0x9], 32  ;;  %s1183_s27 = sld [smem:[#allocation4 + $0x2]]  ;;  %v1186_v8 = vld [vmem:[%s1486_s3 + $0x2] sm:$0x1] }
  0x24   :  { %v1187_v9 = vld [vmem:[%s1486_s3 + $0xa] sm:$0x1] }
  0x29   :  { %s223_s9 = scalar_lea.vmem %s1488_s5, %s1183_s27 }
  0x2a   :  { %243 = vst [vmem:[%s223_s9] sm:$0x1] %v1186_v8  ;;  %245 = vst [vmem:[%s223_s9 + $0x10] sm:$0x1] %v1187_v9 }
  0x2b   :  { %272 = vsyncadd [#allocation2 + $0x2], 32  ;;  %s274_s12 = scalar_lea.vmem %s1489_s6, %s1183_s27  ;;  %v1190_v10 = vld [vmem:[%s1487_s4 + $0x2] sm:$0x1]  ;;  %v1191_v11 = vld [vmem:[%s1487_s4 + $0xa] sm:$0x1] }
  0x2c   :  { %294 = vst [vmem:[%s274_s12] sm:$0x1] %v1190_v10  ;;  %296 = vst [vmem:[%s274_s12 + $0x10] sm:$0x1] %v1191_v11 }
  0x2d   :  { %323 = vsyncadd [#allocation2 + $0xa], 32  ;;  %s1192_s17 = sld [smem:[#allocation4 + $0x3]]  ;;  %v1195_v12 = vld [vmem:[%s1486_s3 + $0x3] sm:$0x1] }
  0x2e   :  { %v1196_v13 = vld [vmem:[%s1486_s3 + $0xb] sm:$0x1] }
  0x33   :  { %s326_s1 = scalar_lea.vmem %s1488_s5, %s1192_s17 }
  0x34   :  { %346 = vst [vmem:[%s326_s1] sm:$0x1] %v1195_v12  ;;  %348 = vst [vmem:[%s326_s1 + $0x10] sm:$0x1] %v1196_v13 }
  0x35   :  { %375 = vsyncadd [#allocation2 + $0x3], 32  ;;  %s377_s25 = scalar_lea.vmem %s1489_s6, %s1192_s17  ;;  %v1199_v14 = vld [vmem:[%s1487_s4 + $0x3] sm:$0x1]  ;;  %v1200_v15 = vld [vmem:[%s1487_s4 + $0xb] sm:$0x1] }
  0x36   :  { %397 = vst [vmem:[%s377_s25] sm:$0x1] %v1199_v14  ;;  %399 = vst [vmem:[%s377_s25 + $0x10] sm:$0x1] %v1200_v15 }
  0x37   :  { %426 = vsyncadd [#allocation2 + $0xb], 32  ;;  %s1201_s29 = sld [smem:[#allocation4 + $0x4]]  ;;  %v1204_v16 = vld [vmem:[%s1486_s3 + $0x4] sm:$0x1] }
  0x38   :  { %v1205_v17 = vld [vmem:[%s1486_s3 + $0xc] sm:$0x1] }
  0x3d   :  { %s429_s12 = scalar_lea.vmem %s1488_s5, %s1201_s29 }
  0x3e   :  { %449 = vst [vmem:[%s429_s12] sm:$0x1] %v1204_v16  ;;  %451 = vst [vmem:[%s429_s12 + $0x10] sm:$0x1] %v1205_v17 }
  0x3f   :  { %478 = vsyncadd [#allocation2 + $0x4], 32  ;;  %s480_s15 = scalar_lea.vmem %s1489_s6, %s1201_s29  ;;  %v1208_v18 = vld [vmem:[%s1487_s4 + $0x4] sm:$0x1]  ;;  %v1209_v19 = vld [vmem:[%s1487_s4 + $0xc] sm:$0x1] }
  0x40   :  { %500 = vst [vmem:[%s480_s15] sm:$0x1] %v1208_v18  ;;  %502 = vst [vmem:[%s480_s15 + $0x10] sm:$0x1] %v1209_v19 }
  0x41   :  { %529 = vsyncadd [#allocation2 + $0xc], 32  ;;  %s1210_s20 = sld [smem:[#allocation4 + $0x5]]  ;;  %v1213_v20 = vld [vmem:[%s1486_s3 + $0x5] sm:$0x1] }
  0x42   :  { %v1214_v21 = vld [vmem:[%s1486_s3 + $0xd] sm:$0x1] }
  0x47   :  { %s532_s25 = scalar_lea.vmem %s1488_s5, %s1210_s20 }
  0x48   :  { %552 = vst [vmem:[%s532_s25] sm:$0x1] %v1213_v20  ;;  %554 = vst [vmem:[%s532_s25 + $0x10] sm:$0x1] %v1214_v21 }
  0x49   :  { %581 = vsyncadd [#allocation2 + $0x5], 32  ;;  %s583_s0 = scalar_lea.vmem %s1489_s6, %s1210_s20  ;;  %v1217_v22 = vld [vmem:[%s1487_s4 + $0x5] sm:$0x1]  ;;  %v1218_v23 = vld [vmem:[%s1487_s4 + $0xd] sm:$0x1] }
  0x4a   :  { %603 = vst [vmem:[%s583_s0] sm:$0x1] %v1217_v22  ;;  %605 = vst [vmem:[%s583_s0 + $0x10] sm:$0x1] %v1218_v23 }
  0x4b   :  { %632 = vsyncadd [#allocation2 + $0xd], 32  ;;  %s1219_s8 = sld [smem:[#allocation4 + $0x6]]  ;;  %v1222_v24 = vld [vmem:[%s1486_s3 + $0x6] sm:$0x1] }
  0x4c   :  { %v1223_v25 = vld [vmem:[%s1486_s3 + $0xe] sm:$0x1] }
  0x51   :  { %s635_s15 = scalar_lea.vmem %s1488_s5, %s1219_s8 }
  0x52   :  { %655 = vst [vmem:[%s635_s15] sm:$0x1] %v1222_v24  ;;  %657 = vst [vmem:[%s635_s15 + $0x10] sm:$0x1] %v1223_v25 }
  0x53   :  { %684 = vsyncadd [#allocation2 + $0x6], 32  ;;  %s686_s18 = scalar_lea.vmem %s1489_s6, %s1219_s8  ;;  %v1226_v26 = vld [vmem:[%s1487_s4 + $0x6] sm:$0x1]  ;;  %v1227_v27 = vld [vmem:[%s1487_s4 + $0xe] sm:$0x1] }
  0x54   :  { %706 = vst [vmem:[%s686_s18] sm:$0x1] %v1226_v26  ;;  %708 = vst [vmem:[%s686_s18 + $0x10] sm:$0x1] %v1227_v27 }
  0x55   :  { %735 = vsyncadd [#allocation2 + $0xe], 32  ;;  %s1228_s23 = sld [smem:[#allocation4 + $0x7]]  ;;  %v1231_v28 = vld [vmem:[%s1486_s3 + $0x7] sm:$0x1] }
  0x56   :  { %v1232_v29 = vld [vmem:[%s1486_s3 + $0xf] sm:$0x1] }
  0x5b   :  { %s738_s0 = scalar_lea.vmem %s1488_s5, %s1228_s23 }
  0x5c   :  { %758 = vst [vmem:[%s738_s0] sm:$0x1] %v1231_v28  ;;  %760 = vst [vmem:[%s738_s0 + $0x10] sm:$0x1] %v1232_v29 }
  0x5d   :  { %787 = vsyncadd [#allocation2 + $0x7], 32  ;;  %s789_s30 = scalar_lea.vmem %s1489_s6, %s1228_s23  ;;  %v1235_v30 = vld [vmem:[%s1487_s4 + $0x7] sm:$0x1]  ;;  %v1236_v31 = vld [vmem:[%s1487_s4 + $0xf] sm:$0x1] }
  0x5e   :  { %809 = vst [vmem:[%s789_s30] sm:$0x1] %v1235_v30  ;;  %811 = vst [vmem:[%s789_s30 + $0x10] sm:$0x1] %v1236_v31 }
  0x5f   :  { %838 = vsyncadd [#allocation2 + $0xf], 32 }
  0x60   :  { %1268 = dma.done.wait [#allocation2], 32 }
  0x61   :  { %1269 = vsyncadd [#allocation2], 4294967264 }
  0x62   :  { %1270 = dma.done.wait [#allocation2 + $0x8], 32 }
  0x63   :  { %1271 = vsyncadd [#allocation2 + $0x8], 4294967264 }
  0x64   :  { %1272 = dma.done.wait [#allocation2 + $0x1], 32 }
  0x65   :  { %1273 = vsyncadd [#allocation2 + $0x1], 4294967264 }
  0x66   :  { %1274 = dma.done.wait [#allocation2 + $0x9], 32 }
  0x67   :  { %1275 = vsyncadd [#allocation2 + $0x9], 4294967264 }
  0x68   :  { %1276 = dma.done.wait [#allocation2 + $0x2], 32 }
  0x69   :  { %1277 = vsyncadd [#allocation2 + $0x2], 4294967264 }
  0x6a   :  { %1278 = dma.done.wait [#allocation2 + $0xa], 32 }
  0x6b   :  { %1279 = vsyncadd [#allocation2 + $0xa], 4294967264 }
  0x6c   :  { %1280 = dma.done.wait [#allocation2 + $0x3], 32 }
  0x6d   :  { %1281 = vsyncadd [#allocation2 + $0x3], 4294967264 }
  0x6e   :  { %1282 = dma.done.wait [#allocation2 + $0xb], 32 }
  0x6f   :  { %1283 = vsyncadd [#allocation2 + $0xb], 4294967264 }
  0x70   :  { %1284 = dma.done.wait [#allocation2 + $0x4], 32 }
  0x71   :  { %1285 = vsyncadd [#allocation2 + $0x4], 4294967264 }
  0x72   :  { %1286 = dma.done.wait [#allocation2 + $0xc], 32 }
  0x73   :  { %1287 = vsyncadd [#allocation2 + $0xc], 4294967264 }
  0x74   :  { %1288 = dma.done.wait [#allocation2 + $0x5], 32 }
  0x75   :  { %1289 = vsyncadd [#allocation2 + $0x5], 4294967264 }
  0x76   :  { %1290 = dma.done.wait [#allocation2 + $0xd], 32 }
  0x77   :  { %1291 = vsyncadd [#allocation2 + $0xd], 4294967264 }
  0x78   :  { %1292 = dma.done.wait [#allocation2 + $0x6], 32 }
  0x79   :  { %1293 = vsyncadd [#allocation2 + $0x6], 4294967264 }
  0x7a   :  { %1294 = dma.done.wait [#allocation2 + $0xe], 32 }
  0x7b   :  { %1295 = vsyncadd [#allocation2 + $0xe], 4294967264 }
  0x7c   :  { %1296 = dma.done.wait [#allocation2 + $0x7], 32 }
  0x7d   :  { %1297 = vsyncadd [#allocation2 + $0x7], 4294967264 }
  0x7e   :  { %1298 = dma.done.wait [#allocation2 + $0xf], 32 }
  0x7f   :  { %1299 = vsyncadd [#allocation2 + $0xf], 4294967264 }
  0x80   :  { %873 = vsyncmov [#allocation2] }
  0x83   :  { %s874_s3 = vpop.sfrf %873 }
  0x84   :  { %p1237_p5 = scmp.ne.s32.totalorder %s874_s3, 0 }
  0x86   :  { %878 = shalt.err (%p1237_p5)  }
  0x87   :  { %880 = vsyncmov [#allocation2 + $0x1] }
  0x8a   :  { %s881_s4 = vpop.sfrf %880 }
  0x8b   :  { %p1238_p6 = scmp.ne.s32.totalorder %s881_s4, 0 }
  0x8d   :  { %885 = shalt.err (%p1238_p6)  }
  0x8e   :  { %887 = vsyncmov [#allocation2 + $0x2] }
  0x91   :  { %s888_s5 = vpop.sfrf %887 }
  0x92   :  { %p1239_p7 = scmp.ne.s32.totalorder %s888_s5, 0 }
  0x94   :  { %892 = shalt.err (%p1239_p7)  }
  0x95   :  { %894 = vsyncmov [#allocation2 + $0x3] }
  0x98   :  { %s895_s6 = vpop.sfrf %894 }
  0x99   :  { %p1240_p8 = scmp.ne.s32.totalorder %s895_s6, 0 }
  0x9b   :  { %899 = shalt.err (%p1240_p8)  }
  0x9c   :  { %901 = vsyncmov [#allocation2 + $0x4] }
  0x9f   :  { %s902_s11 = vpop.sfrf %901 }
  0xa0   :  { %p1241_p9 = scmp.ne.s32.totalorder %s902_s11, 0 }
  0xa2   :  { %906 = shalt.err (%p1241_p9)  }
  0xa3   :  { %908 = vsyncmov [#allocation2 + $0x5] }
  0xa6   :  { %s909_s12 = vpop.sfrf %908 }
  0xa7   :  { %p1242_p10 = scmp.ne.s32.totalorder %s909_s12, 0 }
  0xa9   :  { %913 = shalt.err (%p1242_p10)  }
  0xaa   :  { %915 = vsyncmov [#allocation2 + $0x6] }
  0xad   :  { %s916_s13 = vpop.sfrf %915 }
  0xae   :  { %p1243_p11 = scmp.ne.s32.totalorder %s916_s13, 0 }
  0xb0   :  { %920 = shalt.err (%p1243_p11)  }
  0xb1   :  { %922 = vsyncmov [#allocation2 + $0x7] }
  0xb4   :  { %s923_s14 = vpop.sfrf %922 }
  0xb5   :  { %p1244_p12 = scmp.ne.s32.totalorder %s923_s14, 0 }
  0xb7   :  { %927 = shalt.err (%p1244_p12)  }
  0xb8   :  { %929 = vsyncmov [#allocation2 + $0x8] }
  0xbb   :  { %s930_s15 = vpop.sfrf %929 }
  0xbc   :  { %p1245_p13 = scmp.ne.s32.totalorder %s930_s15, 0 }
  0xbe   :  { %934 = shalt.err (%p1245_p13)  }
  0xbf   :  { %936 = vsyncmov [#allocation2 + $0x9] }
  0xc2   :  { %s937_s16 = vpop.sfrf %936 }
  0xc3   :  { %p1246_p0 = scmp.ne.s32.totalorder %s937_s16, 0 }
  0xc5   :  { %941 = shalt.err (%p1246_p0)  }
  0xc6   :  { %943 = vsyncmov [#allocation2 + $0xa] }
  0xc9   :  { %s944_s17 = vpop.sfrf %943 }
  0xca   :  { %p1247_p1 = scmp.ne.s32.totalorder %s944_s17, 0 }
  0xcc   :  { %948 = shalt.err (%p1247_p1)  }
  0xcd   :  { %950 = vsyncmov [#allocation2 + $0xb] }
  0xd0   :  { %s951_s18 = vpop.sfrf %950 }
  0xd1   :  { %p1248_p2 = scmp.ne.s32.totalorder %s951_s18, 0 }
  0xd3   :  { %955 = shalt.err (%p1248_p2)  }
  0xd4   :  { %957 = vsyncmov [#allocation2 + $0xc] }
  0xd7   :  { %s958_s19 = vpop.sfrf %957 }
  0xd8   :  { %p1249_p3 = scmp.ne.s32.totalorder %s958_s19, 0 }
  0xda   :  { %962 = shalt.err (%p1249_p3)  }
  0xdb   :  { %964 = vsyncmov [#allocation2 + $0xd] }
  0xde   :  { %s965_s20 = vpop.sfrf %964 }
  0xdf   :  { %p1250_p4 = scmp.ne.s32.totalorder %s965_s20, 0 }
  0xe1   :  { %969 = shalt.err (%p1250_p4)  }
  0xe2   :  { %971 = vsyncmov [#allocation2 + $0xe] }
  0xe5   :  { %s972_s21 = vpop.sfrf %971 }
  0xe6   :  { %p1251_p5 = scmp.ne.s32.totalorder %s972_s21, 0 }
  0xe8   :  { %976 = shalt.err (%p1251_p5)  }
  0xe9   :  { %978 = vsyncmov [#allocation2 + $0xf] }
  0xec   :  { %s979_s22 = vpop.sfrf %978 }
  0xed   :  { %p1252_p6 = scmp.ne.s32.totalorder %s979_s22, 0 }
  0xef   :  { %983 = shalt.err (%p1252_p6)  }

</bundles_post_ra>
